<compile_context>
chip_gen: v7x
topology: tpu7x:2x2x1
jax: 0.10.0
libtpu: 0.0.40
codegen_flags: <defaults>
</compile_context>

<pallas_src>
import functools

import jax
import jax.numpy as jnp
from jax.experimental import pallas as pl
from jax.experimental.pallas import tpu as pltpu

_LANE = 128
_SQRT_HALF = 0.7071067811865476          # 1/sqrt(2)
_GELU_TANH_C = 0.7978845608028654        # sqrt(2/pi)


def _round_up(x, m):
    return -(-int(x) // int(m)) * int(m)


@functools.lru_cache(maxsize=1)
def _vmem_budget_bytes():
    """~85% of per-core VMEM (generation-aware); conservative fallback = v7x."""
    try:
        cap = int(pltpu.get_tpu_info().vmem_capacity_bytes)
    except Exception:
        cap = 64 << 20                      # v7x per-TC size: safe everywhere
    return (cap * 85) // 100


def _gelu(h, approximate):
    if approximate:
        # tanh-approx GELU: transcendental lands on the (otherwise idle) EUP.
        return 0.5 * h * (1.0 + jnp.tanh(_GELU_TANH_C * (h + 0.044715 * h * h * h)))
    # exact erf GELU, matching torch.nn.GELU() default (f32 math)
    return 0.5 * h * (1.0 + jax.lax.erf(h * _SQRT_HALF))


def _mlp_resident_kernel(x_ref, w1_ref, b1_ref, w2_ref, b2_ref, o_ref, *,
                         approximate):
    """Grid = (M_tiles,). W1/W2 are VMEM-resident (constant index maps)."""
    # fc1: (tm, Cin) @ (Cin, H) -> f32
    h = jnp.dot(x_ref[...], w1_ref[...], preferred_element_type=jnp.float32)
    h = _gelu(h + b1_ref[...], approximate)
    # drop1/drop2 are Dropout(p=0.0) -> identity
    o = jnp.dot(h.astype(w2_ref.dtype), w2_ref[...],
                preferred_element_type=jnp.float32)
    o_ref[...] = (o + b2_ref[...]).astype(o_ref.dtype)


def _mlp_streaming_kernel(x_ref, w1_ref, b1_ref, w2_ref, b2_ref, o_ref,
                          acc_ref, *, approximate):
    """Grid = (M_tiles, H_tiles). fc2 partial products accumulated over H."""
    k = pl.program_id(1)
    nk = pl.num_programs(1)

    @pl.when(k == 0)
    def _init():
        acc_ref[...] = jnp.zeros_like(acc_ref)

    # fc1 chunk: (tm, Cin) @ (Cin, tH) -> f32
    h = jnp.dot(x_ref[...], w1_ref[...], preferred_element_type=jnp.float32)
    h = _gelu(h + b1_ref[...], approximate)
    # fc2 partial: (tm, tH) @ (tH, Cout) in f32
    partial = jnp.dot(h.astype(w2_ref.dtype), w2_ref[...],
                      preferred_element_type=jnp.float32)

    @pl.when(k < nk - 1)
    def _accumulate():
        acc_ref[...] += partial

    @pl.when(k == nk - 1)
    def _finalize():
        # fused last step: skip the acc store+reload for the final partial
        o_ref[...] = (acc_ref[...] + partial + b2_ref[...]).astype(o_ref.dtype)


def _pad_axis(a, axis, target):
    size = a.shape[axis]
    pad = target - size
    if pad <= 0:
        return a
    widths = [(0, 0)] * a.ndim
    widths[axis] = (0, pad)
    return jnp.pad(a, widths)


@functools.partial(
    jax.jit,
    static_argnames=("tm", "th", "compute_dtype", "use_approx_gelu",
                     "force_streaming"))
def mlp_pallas(x, w1, b1, w2, b2, *, tm=256, th=512,
               compute_dtype=jnp.bfloat16, use_approx_gelu=False,
               force_streaming=False):
    """x: [B, N, Cin]; w1: [Cin, H]; b1: [H]; w2: [H, Cout]; b2: [Cout]."""
    B, N, Cin = x.shape
    H = w1.shape[1]
    Cout = w2.shape[1]
    M = B * N

    out_dtype = x.dtype
    compute_dtype = jnp.dtype(compute_dtype)

    # --- lane/tile-aligned sizes --------------------------------------------
    cin_p = _round_up(Cin, _LANE)
    cout_p = _round_up(Cout, _LANE)
    h_p = _round_up(H, _LANE)
    m8 = _round_up(M, 8)

    # tm: multiple of 8 sublanes, no larger than the (8-aligned) token count.
    tm = max(8, _round_up(min(int(tm), m8), 8))
    # th: multiple of 128 lanes, no larger than padded H.
    th = max(_LANE, (int(th) // _LANE) * _LANE)
    th = min(th, h_p)

    isz = compute_dtype.itemsize
    osz = jnp.dtype(out_dtype).itemsize
    budget = _vmem_budget_bytes()

    def resident_est(tm_):
        return (2 * tm_ * cin_p * isz       # x tiles (double buffered)
                + 2 * cin_p * h_p * isz     # W1 (conservative: 2 buffers)
                + 2 * h_p * cout_p * isz    # W2
                + 2 * tm_ * cout_p * osz    # out tiles
                + tm_ * h_p * 4             # f32 hidden intermediate
                + tm_ * cout_p * 4          # f32 fc2 result pre-cast
                + 4 * (h_p + cout_p))       # f32 biases

    def streaming_est(tm_, th_):
        return (2 * tm_ * cin_p * isz       # x tiles
                + 2 * cin_p * th_ * isz     # W1 chunks
                + 2 * th_ * cout_p * isz    # W2 chunks
                + 2 * tm_ * cout_p * osz    # out tiles
                + tm_ * cout_p * 4          # f32 accumulator scratch
                + tm_ * th_ * 4             # f32 hidden chunk
                + 4 * (h_p + cout_p))       # f32 biases

    use_resident = (not force_streaming) and (resident_est(tm) * 3 // 2 <= budget)

    if use_resident:
        h_pad = h_p
        est = resident_est(tm)
    else:
        # Streaming fallback: W1/W2 are re-fetched per M tile -> grow tm to
        # amortize the weight stream (512-1024 flips v6e to MXU-bound).
        for cand in sorted({tm, 512, 768, 1024}, reverse=True):
            cand = max(8, _round_up(min(cand, m8), 8))
            if streaming_est(cand, th) * 3 // 2 <= budget:
                tm = cand
                break
        h_pad = _round_up(h_p, th)
        est = streaming_est(tm, th)

    m_p = _round_up(M, tm)
    vmem_limit = int(min(max(est * 3 // 2, 32 << 20), budget))

    # --- pad & cast (zero padding is exact; padded M rows sliced off) --------
    x2d = x.reshape(M, Cin)
    x2d = _pad_axis(_pad_axis(x2d, 1, cin_p), 0, m_p).astype(compute_dtype)
    w1p = _pad_axis(_pad_axis(w1, 0, cin_p), 1, h_pad).astype(compute_dtype)
    w2p = _pad_axis(_pad_axis(w2, 0, h_pad), 1, cout_p).astype(compute_dtype)
    b1p = _pad_axis(b1.reshape(1, H), 1, h_pad).astype(jnp.float32)
    b2p = _pad_axis(b2.reshape(1, Cout), 1, cout_p).astype(jnp.float32)

    if use_resident:
        grid = (m_p // tm,)
        in_specs = [
            pl.BlockSpec((tm, cin_p), lambda i: (i, 0)),       # x tile
            pl.BlockSpec((cin_p, h_pad), lambda i: (0, 0)),    # W1 (DMA'd once)
            pl.BlockSpec((1, h_pad), lambda i: (0, 0)),        # b1
            pl.BlockSpec((h_pad, cout_p), lambda i: (0, 0)),   # W2 (DMA'd once)
            pl.BlockSpec((1, cout_p), lambda i: (0, 0)),       # b2
        ]
        out_specs = pl.BlockSpec((tm, cout_p), lambda i: (i, 0))
        scratch_shapes = []
        dims = ("parallel",)
        kernel = functools.partial(_mlp_resident_kernel,
                                   approximate=bool(use_approx_gelu))
    else:
        grid = (m_p // tm, h_pad // th)
        in_specs = [
            pl.BlockSpec((tm, cin_p), lambda i, k: (i, 0)),    # x tile
            pl.BlockSpec((cin_p, th), lambda i, k: (0, k)),    # W1 chunk
            pl.BlockSpec((1, th), lambda i, k: (0, k)),        # b1 chunk
            pl.BlockSpec((th, cout_p), lambda i, k: (k, 0)),   # W2 chunk
            pl.BlockSpec((1, cout_p), lambda i, k: (0, 0)),    # b2
        ]
        out_specs = pl.BlockSpec((tm, cout_p), lambda i, k: (i, 0))
        scratch_shapes = [pltpu.VMEM((tm, cout_p), jnp.float32)]
        dims = ("parallel", "arbitrary")
        kernel = functools.partial(_mlp_streaming_kernel,
                                   approximate=bool(use_approx_gelu))

    out2d = pl.pallas_call(
        kernel,
        out_shape=jax.ShapeDtypeStruct((m_p, cout_p), out_dtype),
        grid_spec=pltpu.PrefetchScalarGridSpec(
            num_scalar_prefetch=0,
            grid=grid,
            in_specs=in_specs,
            out_specs=out_specs,
            scratch_shapes=scratch_shapes,
        ),
        compiler_params=pltpu.CompilerParams(
            dimension_semantics=dims,
            vmem_limit_bytes=vmem_limit),
    )(x2d, w1p, b1p, w2p, b2p)

    return out2d[:M, :Cout].reshape(B, N, Cout)


def mlp_reference(x, w1, b1, w2, b2):
    h = jnp.einsum("bnc,ch->bnh", x, w1) + b1
    h = jax.nn.gelu(h, approximate=False)
    return jnp.einsum("bnh,hc->bnc", h, w2) + b2


if __name__ == "__main__":
    # Small, deterministic example consistent with the module:
    # in_features = 32, hidden_features = 64, out_features = 32
    B, N, Cin, Hf, Cout = 2, 8, 32, 64, 32

    key = jax.random.PRNGKey(0)
    kx, kw1, kb1, kw2, kb2 = jax.random.split(key, 5)

    x = jax.random.normal(kx, (B, N, Cin), dtype=jnp.float32)
    # deterministic "synthetic checkpoint" params (already transposed vs torch)
    w1 = jax.random.normal(kw1, (Cin, Hf), dtype=jnp.float32) * 0.02
    b1 = jax.random.normal(kb1, (Hf,), dtype=jnp.float32) * 0.01
    w2 = jax.random.normal(kw2, (Hf, Cout), dtype=jnp.float32) * 0.02
    b2 = jax.random.normal(kb2, (Cout,), dtype=jnp.float32) * 0.01

    ref = mlp_reference(x, w1, b1, w2, b2)

    # 1) resident-weight fast path, f32 compute.
    out = jax.block_until_ready(
        mlp_pallas(x, w1, b1, w2, b2, compute_dtype=jnp.float32))
    assert out.shape == (B, N, Cout)
    assert jnp.allclose(out, ref, atol=2e-3, rtol=2e-2), "resident f32 mismatch"

    # 2) streaming (H-chunked accumulator) fallback, multiple k steps.
    Hf2 = 320  # pads to 384 -> 3 chunks of th=128
    w1b = jax.random.normal(kw1, (Cin, Hf2), dtype=jnp.float32) * 0.02
    b1b = jax.random.normal(kb1, (Hf2,), dtype=jnp.float32) * 0.01
    w2b = jax.random.normal(kw2, (Hf2, Cout), dtype=jnp.float32) * 0.02
    refb = mlp_reference(x, w1b, b1b, w2b, b2)
    outb = jax.block_until_ready(
        mlp_pallas(x, w1b, b1b, w2b, b2, th=128, compute_dtype=jnp.float32,
                   force_streaming=True))
    assert jnp.allclose(outb, refb, atol=2e-3, rtol=2e-2), "streaming mismatch"

    # 3) default performance path (bf16 compute, f32 accumulation).
    outc = jax.block_until_ready(mlp_pallas(x, w1, b1, w2, b2))
    assert jnp.allclose(outc, ref, atol=5e-2, rtol=5e-2), "bf16 path mismatch"

    print("KERNEL_OK")
</pallas_src>

<mosaic_0001>
module attributes {stable_mosaic.version = 11 : i64} {
  func.func @_mlp_resident_kernel(%arg0: i32, %arg1: memref<16x128xf32, #tpu.memory_space<vmem>>, %arg2: memref<128x128xf32, #tpu.memory_space<vmem>>, %arg3: memref<1x128xf32, #tpu.memory_space<vmem>>, %arg4: memref<128x128xf32, #tpu.memory_space<vmem>>, %arg5: memref<1x128xf32, #tpu.memory_space<vmem>>, %arg6: memref<16x128xf32, #tpu.memory_space<vmem>>) attributes {dimension_semantics = [#tpu.dimension_semantics<parallel>], iteration_bounds = array<i64: 1>, scalar_prefetch = 0 : i64, scratch_operands = 0 : i64, tpu.core_type = #tpu.core_type<tc>, window_params = [{transform_indices = @transform_0, window_bounds = array<i64: 16, 128>}, {pipeline_mode = #tpu.pipeline_mode<synchronous>, transform_indices = @transform_1, window_bounds = array<i64: 128, 128>}, {pipeline_mode = #tpu.pipeline_mode<synchronous>, transform_indices = @transform_2, window_bounds = array<i64: 1, 128>}, {pipeline_mode = #tpu.pipeline_mode<synchronous>, transform_indices = @transform_3, window_bounds = array<i64: 128, 128>}, {pipeline_mode = #tpu.pipeline_mode<synchronous>, transform_indices = @transform_4, window_bounds = array<i64: 1, 128>}, {transform_indices = @transform_5, window_bounds = array<i64: 16, 128>}]} {
    %c0 = arith.constant 0 : index
    %c0_0 = arith.constant 0 : index
    %0 = vector.load %arg1[%c0, %c0_0] : memref<16x128xf32, #tpu.memory_space<vmem>>, vector<16x128xf32>
    %c0_1 = arith.constant 0 : index
    %c0_2 = arith.constant 0 : index
    %1 = vector.load %arg2[%c0_1, %c0_2] : memref<128x128xf32, #tpu.memory_space<vmem>>, vector<128x128xf32>
    %cst = arith.constant dense<0.000000e+00> : vector<16x128xf32>
    %2 = tpu.matmul %0, %1, %cst {dimension_numbers = #tpu.dot_dimension_numbers<[1], [0], [0], [1], [0, 0, 1, 1], [], []>} : vector<16x128xf32>, vector<128x128xf32>, vector<16x128xf32> -> vector<16x128xf32>
    %c0_3 = arith.constant 0 : index
    %c0_4 = arith.constant 0 : index
    %3 = vector.load %arg3[%c0_3, %c0_4] : memref<1x128xf32, #tpu.memory_space<vmem>>, vector<1x128xf32>
    %4 = vector.broadcast %3 : vector<1x128xf32> to vector<16x128xf32>
    %5 = arith.addf %2, %4 : vector<16x128xf32>
    %cst_5 = arith.constant 5.000000e-01 : f32
    %6 = vector.broadcast %cst_5 : f32 to vector<16x128xf32>
    %7 = arith.mulf %6, %5 : vector<16x128xf32>
    %cst_6 = arith.constant 0.707106769 : f32
    %8 = vector.broadcast %cst_6 : f32 to vector<16x128xf32>
    %9 = arith.mulf %5, %8 : vector<16x128xf32>
    %10 = math.erf %9 : vector<16x128xf32>
    %cst_7 = arith.constant 1.000000e+00 : f32
    %11 = vector.broadcast %cst_7 : f32 to vector<16x128xf32>
    %12 = arith.addf %11, %10 : vector<16x128xf32>
    %13 = arith.mulf %7, %12 : vector<16x128xf32>
    %c0_8 = arith.constant 0 : index
    %c0_9 = arith.constant 0 : index
    %14 = vector.load %arg4[%c0_8, %c0_9] : memref<128x128xf32, #tpu.memory_space<vmem>>, vector<128x128xf32>
    %cst_10 = arith.constant dense<0.000000e+00> : vector<16x128xf32>
    %15 = tpu.matmul %13, %14, %cst_10 {dimension_numbers = #tpu.dot_dimension_numbers<[1], [0], [0], [1], [0, 0, 1, 1], [], []>} : vector<16x128xf32>, vector<128x128xf32>, vector<16x128xf32> -> vector<16x128xf32>
    %c0_11 = arith.constant 0 : index
    %c0_12 = arith.constant 0 : index
    %16 = vector.load %arg5[%c0_11, %c0_12] : memref<1x128xf32, #tpu.memory_space<vmem>>, vector<1x128xf32>
    %17 = vector.broadcast %16 : vector<1x128xf32> to vector<16x128xf32>
    %18 = arith.addf %15, %17 : vector<16x128xf32>
    %c0_13 = arith.constant 0 : index
    %c0_14 = arith.constant 0 : index
    %19 = vector.load %arg6[%c0_13, %c0_14] : memref<16x128xf32, #tpu.memory_space<vmem>>, vector<16x128xf32>
    tpu.vector_store %arg6[%c0_13, %c0_14], %18 {strides = array<i32>} : memref<16x128xf32, #tpu.memory_space<vmem>>, vector<16x128xf32>,
    return
  }
  func.func @transform_0(%arg0: i32) -> (i32, i32) {
    %c0_i32 = arith.constant 0 : i32
    %c0_i32_0 = arith.constant 0 : i32
    return %arg0, %c0_i32 : i32, i32
  }
  func.func @transform_1(%arg0: i32) -> (i32, i32) {
    %c0_i32 = arith.constant 0 : i32
    %c0_i32_0 = arith.constant 0 : i32
    %c0_i32_1 = arith.constant 0 : i32
    return %c0_i32, %c0_i32_0 : i32, i32
  }
  func.func @transform_2(%arg0: i32) -> (i32, i32) {
    %c0_i32 = arith.constant 0 : i32
    %c0_i32_0 = arith.constant 0 : i32
    %c0_i32_1 = arith.constant 0 : i32
    return %c0_i32, %c0_i32_0 : i32, i32
  }
  func.func @transform_3(%arg0: i32) -> (i32, i32) {
    %c0_i32 = arith.constant 0 : i32
    %c0_i32_0 = arith.constant 0 : i32
    %c0_i32_1 = arith.constant 0 : i32
    return %c0_i32, %c0_i32_0 : i32, i32
  }
  func.func @transform_4(%arg0: i32) -> (i32, i32) {
    %c0_i32 = arith.constant 0 : i32
    %c0_i32_0 = arith.constant 0 : i32
    %c0_i32_1 = arith.constant 0 : i32
    return %c0_i32, %c0_i32_0 : i32, i32
  }
  func.func @transform_5(%arg0: i32) -> (i32, i32) {
    %c0_i32 = arith.constant 0 : i32
    %c0_i32_0 = arith.constant 0 : i32
    return %arg0, %c0_i32 : i32, i32
  }
}

</mosaic_0001>

<bundles_post_ra>
// kernel: mlp_pallas.1
= control target key start
LH: loop header
LB: loop body
LE: loop exit
PB: predicated region body
PF: predicated region fallthrough
CT: control target
= control target key end

     0   :  { %s554_s1 = inlined_call_operand.vmem [shape: f32[128,128], index: 1, kind: input, shape index: {}]   ;;  %s555_s0 = inlined_call_operand.vmem [shape: f32[16,128], index: 0, kind: input, shape index: {}]   ;;  %s556_s3 = inlined_call_operand.vmem [shape: f32[128,128], index: 3, kind: input, shape index: {}]   ;;  %s557_s2 = inlined_call_operand.vmem [shape: f32[1,128], index: 2, kind: input, shape index: {}]   ;;  %s558_s4 = inlined_call_operand.vmem [shape: f32[1,128], index: 4, kind: input, shape index: {}]   ;;  %s559_s5 = inlined_call_operand.vmem [shape: f32[16,128], index: 5, kind: output, shape index: {}]  }
   0x1   :  { %v22_v0 = vld [vmem:[%s554_s1] sm:$0xff]  ;;  %v23_v1 = vld [vmem:[%s554_s1 + $0x8] sm:$0xff]  ;;  %v24_v2 = vld [vmem:[%s554_s1 + $0x10] sm:$0xff] }
   0x2   :  { %v342_v3 = vpack.c.bf16 %v23_v1, %v22_v0  ;;  %v25_v4 = vld [vmem:[%s554_s1 + $0x18] sm:$0xff]  ;;  %v26_v6 = vld [vmem:[%s554_s1 + $0x20] sm:$0xff]  ;;  %v27_v7 = vld [vmem:[%s554_s1 + $0x28] sm:$0xff] }
   0x3   :  { %v346_v5 = vpack.c.bf16 %v25_v4, %v24_v2  ;;  %v350_v8 = vpack.c.bf16 %v27_v7, %v26_v6  ;;  %v28_v9 = vld [vmem:[%s554_s1 + $0x30] sm:$0xff]  ;;  %v29_v10 = vld [vmem:[%s554_s1 + $0x38] sm:$0xff]  ;;  %v20_v11 = vld [vmem:[%s555_s0] sm:$0xff] }
   0x4   :  { %343 = vmatprep.subr.bf16.mxu0 %v342_v3  ;;  %304 = vmatprep.mubr.f32.mxu0 %v20_v11  ;;  %v130_v12 = vld [vmem:[%s556_s3] sm:$0xff]  ;;  %v131_v13 = vld [vmem:[%s556_s3 + $0x8] sm:$0xff]  ;;  %v132_v14 = vld [vmem:[%s556_s3 + $0x10] sm:$0xff]  ;;  %v354_v20 = vpack.c.bf16 %v29_v10, %v28_v9 }
   0x5   :  { %345 = vmatpush3.bf16.msra.mxu0 %v342_v3  ;;  %v374_v15 = vpack.c.bf16 %v131_v13, %v130_v12  ;;  %v133_v16 = vld [vmem:[%s556_s3 + $0x18] sm:$0xff]  ;;  %v134_v18 = vld [vmem:[%s556_s3 + $0x20] sm:$0xff]  ;;  %v135_v19 = vld [vmem:[%s556_s3 + $0x28] sm:$0xff] }
   0x6   :  { %347 = vmatprep.subr.bf16.mxu0 %v346_v5  ;;  %v378_v17 = vpack.c.bf16 %v133_v16, %v132_v14  ;;  %v30_v21 = vld [vmem:[%s554_s1 + $0x40] sm:$0xff]  ;;  %v31_v22 = vld [vmem:[%s554_s1 + $0x48] sm:$0xff]  ;;  %v382_v23 = vpack.c.bf16 %v135_v19, %v134_v18  ;;  %v32_v25 = vld [vmem:[%s554_s1 + $0x50] sm:$0xff] }
   0x7   :  { %375 = vmatprep.subr.bf16.mxu1 %v374_v15  ;;  %v358_v24 = vpack.c.bf16 %v31_v22, %v30_v21  ;;  %v33_v26 = vld [vmem:[%s554_s1 + $0x58] sm:$0xff]  ;;  %v34_v28 = vld [vmem:[%s554_s1 + $0x60] sm:$0xff]  ;;  %v35_v29 = vld [vmem:[%s554_s1 + $0x68] sm:$0xff] }
   0x8   :  { %377 = vmatpush3.bf16.msra.mxu1 %v374_v15  ;;  %v362_v27 = vpack.c.bf16 %v33_v26, %v32_v25  ;;  %v366_v30 = vpack.c.bf16 %v35_v29, %v34_v28  ;;  %v36_v31 = vld [vmem:[%s554_s1 + $0x70] sm:$0xff]  ;;  %v37_v32 = vld [vmem:[%s554_s1 + $0x78] sm:$0xff]  ;;  %v21_v34 = vld [vmem:[%s555_s0 + $0x8] sm:$0xff] }
   0x9   :  { %349 = vmatpush3.bf16.msra.mxu0 %v346_v5  ;;  %379 = vmatprep.subr.bf16.mxu1 %v378_v17  ;;  %v370_v33 = vpack.c.bf16 %v37_v32, %v36_v31  ;;  %v136_v35 = vld [vmem:[%s556_s3 + $0x30] sm:$0xff]  ;;  %v137_v36 = vld [vmem:[%s556_s3 + $0x38] sm:$0xff]  ;;  %v138_v38 = vld [vmem:[%s556_s3 + $0x40] sm:$0xff] }
   0xa   :  { %351 = vmatprep.subr.bf16.mxu0 %v350_v8  ;;  %v386_v37 = vpack.c.bf16 %v137_v36, %v136_v35  ;;  %v139_v39 = vld [vmem:[%s556_s3 + $0x48] sm:$0xff]  ;;  %v140_v41 = vld [vmem:[%s556_s3 + $0x50] sm:$0xff]  ;;  %v141_v42 = vld [vmem:[%s556_s3 + $0x58] sm:$0xff] }
   0xb   :  { %v390_v40 = vpack.c.bf16 %v139_v39, %v138_v38  ;;  %v394_v43 = vpack.c.bf16 %v141_v42, %v140_v41  ;;  %v142_v44 = vld [vmem:[%s556_s3 + $0x60] sm:$0xff]  ;;  %v143_v45 = vld [vmem:[%s556_s3 + $0x68] sm:$0xff]  ;;  %v144_v47 = vld [vmem:[%s556_s3 + $0x70] sm:$0xff] }
   0xc   :  { %381 = vmatpush3.bf16.msra.mxu1 %v378_v17  ;;  %v398_v46 = vpack.c.bf16 %v143_v45, %v142_v44  ;;  %v145_v48 = vld [vmem:[%s556_s3 + $0x78] sm:$0xff]  ;;  %v234_v50 = vld [vmem:[%s557_s2] ss:$0 sm:$0xff] }
   0xd   :  { %353 = vmatpush3.bf16.msra.mxu0 %v350_v8  ;;  %383 = vmatprep.subr.bf16.mxu1 %v382_v23  ;;  %v402_v49 = vpack.c.bf16 %v145_v48, %v144_v47  ;;  %v235_v1 = vld [vmem:[%s558_s4] ss:$0 sm:$0xff] }
   0xe   :  { %355 = vmatprep.subr.bf16.mxu0 %v354_v20 }
  0x10   :  { %385 = vmatpush3.bf16.msra.mxu1 %v382_v23 }
  0x11   :  { %357 = vmatpush3.bf16.msra.mxu0 %v354_v20  ;;  %387 = vmatprep.subr.bf16.mxu1 %v386_v37 }
  0x12   :  { %359 = vmatprep.subr.bf16.mxu0 %v358_v24 }
  0x14   :  { %389 = vmatpush3.bf16.msra.mxu1 %v386_v37 }
  0x15   :  { %361 = vmatpush3.bf16.msra.mxu0 %v358_v24  ;;  %391 = vmatprep.subr.bf16.mxu1 %v390_v40 }
  0x16   :  { %363 = vmatprep.subr.bf16.mxu0 %v362_v27 }
  0x18   :  { %393 = vmatpush3.bf16.msra.mxu1 %v390_v40 }
  0x19   :  { %365 = vmatpush3.bf16.msra.mxu0 %v362_v27  ;;  %395 = vmatprep.subr.bf16.mxu1 %v394_v43 }
  0x1a   :  { %367 = vmatprep.subr.bf16.mxu0 %v366_v30 }
  0x1c   :  { %397 = vmatpush3.bf16.msra.mxu1 %v394_v43 }
  0x1d   :  { %369 = vmatpush3.bf16.msra.mxu0 %v366_v30  ;;  %399 = vmatprep.subr.bf16.mxu1 %v398_v46 }
  0x1e   :  { %371 = vmatprep.subr.bf16.mxu0 %v370_v33 }
  0x20   :  { %401 = vmatpush3.bf16.msra.mxu1 %v398_v46 }
  0x21   :  { %373 = vmatpush3.bf16.msra.mxu0 %v370_v33  ;;  %403 = vmatprep.subr.bf16.mxu1 %v402_v49 }
  0x24   :  { %305 = vmatmul.mubr.f32.vlgmr.msra.gmra.mrb[0].mxu0 %v21_v34  ;;  %405 = vmatpush3.bf16.msra.mxu1 %v402_v49 }
  0xf7   :  { %v306_v51 = vpop.f32.mrb[0].mxu0 }
  0xf8   :  { %v117_v52 = vadd.f32 %v306_v51, %v234_v50  ;;  %v111_v53 = vpop.f32.mrb[1].mxu0 }
  0xf9   :  { %v112_v54 = vadd.f32 %v234_v50, %v111_v53 }
  0xfa   :  { %v123_v55 = vmul.f32 0.70710677, %v117_v52  ;;  %v121_v62 = vmul.f32 0.5, %v117_v52 }
  0xfb   :  { %v122_v56 = vmul.f32 0.70710677, %v112_v54  ;;  %v120_v60 = vmul.f32 0.5, %v112_v54 }
  0xfc   :  { %406 = verf.f32 %v123_v55 }
  0xfd   :  { %408 = verf.f32 %v122_v56 }
 0x106   :  { %v407_v57 = vpop.eup %406 }
 0x107   :  { %v409_v58 = vpop.eup %408  ;;  %v127_v59 = vadd.f32 1.0, %v407_v57 }
 0x108   :  { %v126_v61 = vadd.f32 1.0, %v409_v58 }
 0x109   :  { %v129_v0 = vmul.f32 %v127_v59, %v121_v62 }
 0x10a   :  { %v128_v63 = vmul.f32 %v126_v61, %v120_v60 }
 0x10c   :  { %339 = vmatprep.mubr.f32.mxu1 %v128_v63 }
 0x10d   :  { %340 = vmatmul.mubr.f32.vlgmr.msra.gmra.mrb[0].mxu1 %v129_v0 }
 0x1e0   :  { %v341_v2 = vpop.f32.mrb[0].mxu1 }
 0x1e1   :  { %v225_v3 = vadd.f32 %v341_v2, %v235_v1  ;;  %v219_v4 = vpop.f32.mrb[1].mxu1 }
 0x1e2   :  { %v220_v5 = vadd.f32 %v235_v1, %v219_v4 }
 0x1e3   :  { %229 = vst [vmem:[%s559_s5 + $0x8] sm:$0xff] %v225_v3 }
 0x1e4   :  { %228 = vst [vmem:[%s559_s5] sm:$0xff] %v220_v5 }

</bundles_post_ra>
